<compile_context>
chip_gen: v5e
topology: v5e:2x2
jax: 0.10.0
libtpu: 0.0.40
codegen_flags: <defaults>
</compile_context>

<pallas_src>
import jax
import jax.numpy as jnp
from jax.experimental import pallas as pl
from jax.experimental.pallas import tpu as pltpu


def _round_up(a, m):
    return -(-a // m) * m


def preference_attention(x, wq, bq, wk, bk, wv, bv, *,
                         batch_block=None,
                         mxu_dtype=jnp.bfloat16,
                         out_dtype=jnp.float32):
    """PreferenceAttention forward.

    x: (B, T, E) float32.  Weights in PyTorch nn.Linear layout:
      wq/wk: (E, E) = (out, in); wv: (1, E); bq/bk: (E,); bv: (1,).

    Returns (logits (B, 1), {"reward_attn_weights": (B, T, T), "values": (B, T, 1)}).

    batch_block: batch elements per grid step (BB). None -> auto: targets
      BB*T ~ 256 for the MXU M dim, halved until the tile fits a ~40 MiB VMEM
      budget (v7x-safe).  B is padded up to a multiple of BB.
    mxu_dtype: MXU operand dtype (bf16 default -> ~3-6x matmul throughput on
      v5e/v6e/v7x; accumulation, mask and softmax stay f32).  Use jnp.float32
      for exact parity with the fp32 PyTorch module.
    out_dtype: dtype of logits/attn/values outputs (bf16 halves the HBM
      writeback stream — the bottleneck on v5e).
    """
    B, T, E = x.shape
    Qpad = _round_up(E, 128)      # lane-aligned width of the Q and K blocks
    VPAD = 128                    # value column gets its own lane-aligned chunk
    Nw = 2 * Qpad + VPAD
    mxu_isz = jnp.dtype(mxu_dtype).itemsize
    out_isz = jnp.dtype(out_dtype).itemsize

    # Cast x up-front only if T is sublane-aligned for mxu_dtype (8 rows for
    # f32, 16 for bf16); otherwise keep it f32 and cast in-kernel so the
    # (BB, T, E) -> (BB*T, E) reshape stays layout-free.
    cast_x = (T % (32 // mxu_isz) == 0)
    x_in = x.astype(mxu_dtype) if cast_x else jnp.asarray(x, jnp.float32)
    x_isz = jnp.dtype(x_in.dtype).itemsize

    # ---- batch-block (BB) selection ---------------------------------------
    if batch_block is None:
        bb = max(1, min(256 // max(T, 1), 64))       # target BB*T ~ 256
    else:
        bb = max(1, int(batch_block))
    bb = max(1, min(bb, B))

    def _vmem_bytes(bb_):
        m = bb_ * T
        blk_in = m * E * x_isz + E * Nw * mxu_isz + Nw * 4
        blk_out = bb_ * T * T * out_isz + m * out_isz + bb_ * out_isz
        interm = 4 * (m * Nw + 2 * m * Qpad + 3 * bb_ * T * T + 6 * m)
        return 2 * (blk_in + blk_out) + interm       # x2 for double-buffering

    _VMEM_BUDGET = 40 * 1024 * 1024                  # safe on v7x (64 MiB / TC)
    while bb > 1 and _vmem_bytes(bb) > _VMEM_BUDGET:
        bb //= 2

    num_blocks = pl.cdiv(B, bb)
    b_pad = num_blocks * bb
    if b_pad != B:                                   # pad instead of shrinking bb
        x_in = jnp.pad(x_in, ((0, b_pad - B), (0, 0), (0, 0)))

    # ---- fused projection weight: [ wq^T | wk^T | wv column ] -------------
    # Padding columns are exactly zero, so contracting the padded Qpad lanes of
    # q/k for the scores is exact, and the value chunk reduces to its column 0.
    w = jnp.zeros((E, Nw), jnp.float32)
    w = w.at[:, :E].set(jnp.asarray(wq, jnp.float32).T)
    w = w.at[:, Qpad:Qpad + E].set(jnp.asarray(wk, jnp.float32).T)
    w = w.at[:, 2 * Qpad].set(jnp.asarray(wv, jnp.float32).reshape(E))
    w = w.astype(mxu_dtype)

    brow = jnp.zeros((1, Nw), jnp.float32)
    brow = brow.at[0, :E].set(jnp.asarray(bq, jnp.float32))
    brow = brow.at[0, Qpad:Qpad + E].set(jnp.asarray(bk, jnp.float32))
    brow = brow.at[0, 2 * Qpad].set(jnp.asarray(bv, jnp.float32).reshape(()))

    flatten_attn = T < 128        # lane-dense flattened store for small T
    m_rows = bb * T

    # ---- kernel ------------------------------------------------------------
    def kernel(x_ref, w_ref, b_ref, logits_ref, attn_ref, values_ref):
        # One fused MXU projection for Q, K and V (f32 accumulation, f32 bias).
        x2 = x_ref[...].reshape(m_rows, E).astype(mxu_dtype)
        p = jnp.dot(x2, w_ref[...], preferred_element_type=jnp.float32)
        p = p + b_ref[...]                                    # (BB*T, Nw) f32

        q3 = p[:, :Qpad].reshape(bb, T, Qpad).astype(mxu_dtype)
        k3 = p[:, Qpad:2 * Qpad].reshape(bb, T, Qpad).astype(mxu_dtype)
        # Value column lives at lane 2*Qpad; the rest of its 128-lane chunk is
        # exactly zero, so a lane-sum extracts it (no unaligned slice needed).
        v_flat = jnp.sum(p[:, 2 * Qpad:], axis=1)             # (BB*T,) f32

        # Scores.  Reference divides by sqrt(value.shape[-1]) = sqrt(1) = 1,
        # so the scale is omitted (dead work).
        s = jnp.einsum("bqe,bke->bqk", q3, k3,
                       preferred_element_type=jnp.float32)    # (BB, T, T) f32

        # Causal mask from a single (T, T) compare, broadcast over the batch.
        qi = jax.lax.broadcasted_iota(jnp.int32, (T, T), 0)
        ki = jax.lax.broadcasted_iota(jnp.int32, (T, T), 1)
        s = jnp.where((ki > qi)[None, :, :], -jnp.inf, s)

        # Softmax over keys (f32).  Exact reciprocal so rows sum to 1.
        mx = jnp.max(s, axis=-1, keepdims=True)
        ex = jnp.exp(s - mx)
        denom = jnp.sum(ex, axis=-1, keepdims=True)
        attn = ex * pl.reciprocal(denom, approx=False)        # (BB, T, T)

        # Dropout(p=0.0) in the reference module -> identity at inference.

        # logits[b] = sum_q attn[b,q,:].v[b,:] = sum_k (sum_q attn[b,q,k]) v[b,k]
        v_bt = v_flat.reshape(bb, T)
        logits = jnp.sum(jnp.sum(attn, axis=1) * v_bt, axis=-1)   # (BB,)

        logits_ref[...] = logits.reshape(1, 1, bb).astype(logits_ref.dtype)
        values_ref[...] = v_flat.reshape(1, 1, m_rows).astype(values_ref.dtype)
        if flatten_attn:
            attn_ref[...] = attn.reshape(1, bb, T * T).astype(attn_ref.dtype)
        else:
            attn_ref[...] = attn.reshape(1, bb, T, T).astype(attn_ref.dtype)

    # ---- specs -------------------------------------------------------------
    if flatten_attn:
        attn_shape = jax.ShapeDtypeStruct((num_blocks, bb, T * T), out_dtype)
        attn_spec = pl.BlockSpec((1, bb, T * T), lambda b: (b, 0, 0))
    else:
        attn_shape = jax.ShapeDtypeStruct((num_blocks, bb, T, T), out_dtype)
        attn_spec = pl.BlockSpec((1, bb, T, T), lambda b: (b, 0, 0, 0))

    out_shapes = (
        jax.ShapeDtypeStruct((num_blocks, 1, bb), out_dtype),       # logits
        attn_shape,                                                  # attn
        jax.ShapeDtypeStruct((num_blocks, 1, m_rows), out_dtype),   # values
    )

    grid_spec = pltpu.PrefetchScalarGridSpec(
        num_scalar_prefetch=0,
        grid=(num_blocks,),
        in_specs=[
            pl.BlockSpec((bb, T, E), lambda b: (b, 0, 0)),   # x slab
            pl.BlockSpec((E, Nw), lambda b: (0, 0)),         # fused weight
            pl.BlockSpec((1, Nw), lambda b: (0, 0)),         # fused bias row
        ],
        out_specs=[
            pl.BlockSpec((1, 1, bb), lambda b: (b, 0, 0)),
            attn_spec,
            pl.BlockSpec((1, 1, m_rows), lambda b: (b, 0, 0)),
        ],
    )

    vmem_limit = int(min(64 * 1024 * 1024,
                         max(32 * 1024 * 1024, 2 * _vmem_bytes(bb))))
    cost = pl.CostEstimate(
        flops=int(2 * b_pad * T * E * Nw           # fused projection
                  + 2 * b_pad * T * T * Qpad       # scores
                  + 8 * b_pad * T * T),            # mask + softmax elementwise
        transcendentals=int(b_pad * T * T),
        bytes_accessed=int(x_in.size * x_isz
                           + num_blocks * (w.size * mxu_isz + brow.size * 4)
                           + b_pad * T * T * out_isz
                           + b_pad * T * out_isz
                           + b_pad * out_isz),
    )

    logits_raw, attn_raw, values_raw = pl.pallas_call(
        kernel,
        out_shape=out_shapes,
        grid_spec=grid_spec,
        compiler_params=pltpu.CompilerParams(
            dimension_semantics=("parallel",),
            vmem_limit_bytes=vmem_limit,
        ),
        cost_estimate=cost,
    )(x_in, w, brow)

    logits = logits_raw.reshape(b_pad, 1)[:B]
    attn = attn_raw.reshape(b_pad, T, T)[:B]
    values = values_raw.reshape(b_pad, T, 1)[:B]
    aux_output = {"reward_attn_weights": attn, "values": values}
    return logits, aux_output


def _reference(x, wq, bq, wk, bk, wv, bv):
    """Pure-JAX reference mirroring the PyTorch forward."""
    q = jnp.einsum("bte,oe->bto", x, wq) + bq
    k = jnp.einsum("bte,oe->bto", x, wk) + bk
    v = jnp.einsum("bte,oe->bto", x, wv) + bv            # (B, T, 1)
    s = jnp.einsum("bqe,bke->bqk", q, k) / (v.shape[-1] ** 0.5)
    T = x.shape[1]
    mask = jnp.triu(jnp.ones((T, T), dtype=bool), k=1)
    s = jnp.where(mask[None], -jnp.inf, s)
    attn = jax.nn.softmax(s, axis=-1)
    logits = jnp.sum(jnp.einsum("bqk,bko->bqo", attn, v), axis=1)
    return logits, attn, v


if __name__ == "__main__":
    key = jax.random.PRNGKey(0)
    B, T, E = 2, 8, 32  # batch, seq, n_embed

    k_x, k_wq, k_bq, k_wk, k_bk, k_wv, k_bv = jax.random.split(key, 7)
    x = jax.random.normal(k_x, (B, T, E), dtype=jnp.float32)

    # Deterministic parameters (nn.Linear shapes: weight (out, in), bias (out,))
    wq = jax.random.normal(k_wq, (E, E), dtype=jnp.float32) * 0.1
    bq = jax.random.normal(k_bq, (E,), dtype=jnp.float32) * 0.1
    wk = jax.random.normal(k_wk, (E, E), dtype=jnp.float32) * 0.1
    bk = jax.random.normal(k_bk, (E,), dtype=jnp.float32) * 0.1
    wv = jax.random.normal(k_wv, (1, E), dtype=jnp.float32) * 0.1
    bv = jax.random.normal(k_bv, (1,), dtype=jnp.float32) * 0.1

    ref_logits, ref_attn, ref_v = _reference(x, wq, bq, wk, bk, wv, bv)

    # Exact-parity path (f32 MXU operands) -> tight tolerances.
    logits32, aux32 = preference_attention(x, wq, bq, wk, bk, wv, bv,
                                           mxu_dtype=jnp.float32)
    jax.block_until_ready((logits32, aux32))
    assert jnp.allclose(logits32, ref_logits, atol=2e-3, rtol=2e-3)
    assert jnp.allclose(aux32["reward_attn_weights"], ref_attn, atol=2e-3, rtol=2e-3)
    assert jnp.allclose(aux32["values"], ref_v, atol=2e-3, rtol=2e-3)

    # Default fast path (bf16 MXU operands, f32 accumulation and softmax).
    logits, aux = preference_attention(x, wq, bq, wk, bk, wv, bv)
    jax.block_until_ready((logits, aux))
    assert jnp.allclose(logits, ref_logits, atol=1.5e-1, rtol=1e-1)
    assert jnp.allclose(aux["reward_attn_weights"], ref_attn, atol=5e-2, rtol=5e-2)
    assert jnp.allclose(aux["values"], ref_v, atol=3e-2, rtol=3e-2)

    print("KERNEL_OK")
</pallas_src>

<mosaic_0001>
module attributes {stable_mosaic.version = 11 : i64} {
  func.func @kernel(%arg0: i32, %arg1: memref<2x8x32xf32, #tpu.memory_space<vmem>>, %arg2: memref<32x384xf32, #tpu.memory_space<vmem>>, %arg3: memref<1x384xf32, #tpu.memory_space<vmem>>, %arg4: memref<1x1x2xf32, #tpu.memory_space<vmem>>, %arg5: memref<1x2x64xf32, #tpu.memory_space<vmem>>, %arg6: memref<1x1x16xf32, #tpu.memory_space<vmem>>) attributes {dimension_semantics = [#tpu.dimension_semantics<parallel>], iteration_bounds = array<i64: 1>, scalar_prefetch = 0 : i64, scratch_operands = 0 : i64, tpu.core_type = #tpu.core_type<tc>, window_params = [{transform_indices = @transform_0, window_bounds = array<i64: 2, 8, 32>}, {pipeline_mode = #tpu.pipeline_mode<synchronous>, transform_indices = @transform_1, window_bounds = array<i64: 32, 384>}, {pipeline_mode = #tpu.pipeline_mode<synchronous>, transform_indices = @transform_2, window_bounds = array<i64: 1, 384>}, {transform_indices = @transform_3, window_bounds = array<i64: 1, 1, 2>}, {transform_indices = @transform_4, window_bounds = array<i64: 1, 2, 64>}, {transform_indices = @transform_5, window_bounds = array<i64: 1, 1, 16>}]} {
    %c0 = arith.constant 0 : index
    %c0_0 = arith.constant 0 : index
    %c0_1 = arith.constant 0 : index
    %0 = vector.load %arg1[%c0, %c0_0, %c0_1] : memref<2x8x32xf32, #tpu.memory_space<vmem>>, vector<2x8x32xf32>
    %1 = vector.shape_cast %0 : vector<2x8x32xf32> to vector<16x32xf32>
    %c0_2 = arith.constant 0 : index
    %c0_3 = arith.constant 0 : index
    %2 = vector.load %arg2[%c0_2, %c0_3] : memref<32x384xf32, #tpu.memory_space<vmem>>, vector<32x384xf32>
    %cst = arith.constant dense<0.000000e+00> : vector<16x384xf32>
    %3 = tpu.matmul %1, %2, %cst {dimension_numbers = #tpu.dot_dimension_numbers<[1], [0], [0], [1], [0, 0, 1, 1], [], []>} : vector<16x32xf32>, vector<32x384xf32>, vector<16x384xf32> -> vector<16x384xf32>
    %c0_4 = arith.constant 0 : index
    %c0_5 = arith.constant 0 : index
    %4 = vector.load %arg3[%c0_4, %c0_5] : memref<1x384xf32, #tpu.memory_space<vmem>>, vector<1x384xf32>
    %5 = vector.broadcast %4 : vector<1x384xf32> to vector<16x384xf32>
    %6 = arith.addf %3, %5 : vector<16x384xf32>
    %7 = vector.extract_strided_slice %6 {offsets = [0, 0], sizes = [16, 128], strides = [1, 1]} : vector<16x384xf32> to vector<16x128xf32>
    %8 = vector.shape_cast %7 : vector<16x128xf32> to vector<2x8x128xf32>
    %9 = vector.extract_strided_slice %6 {offsets = [0, 128], sizes = [16, 128], strides = [1, 1]} : vector<16x384xf32> to vector<16x128xf32>
    %10 = vector.shape_cast %9 : vector<16x128xf32> to vector<2x8x128xf32>
    %11 = vector.extract_strided_slice %6 {offsets = [0, 256], sizes = [16, 128], strides = [1, 1]} : vector<16x384xf32> to vector<16x128xf32>
    %cst_6 = arith.constant dense<0.000000e+00> : vector<16xf32>
    %12 = vector.multi_reduction <add>, %11, %cst_6 [1] : vector<16x128xf32> to vector<16xf32>
    "tpu.trace_start"() <{level = 10 : i32, message = "bqe,bke->bqk"}> : () -> ()
    %cst_7 = arith.constant dense<0.000000e+00> : vector<2x8x8xf32>
    %13 = tpu.matmul %8, %10, %cst_7 {dimension_numbers = #tpu.dot_dimension_numbers<[2], [2], [1], [1], [0, 0, 0, 1, 1, 1], [0], [0]>} : vector<2x8x128xf32>, vector<2x8x128xf32>, vector<2x8x8xf32> -> vector<2x8x8xf32>
    "tpu.trace_stop"() : () -> ()
    %14 = tpu.iota {dimensions = array<i32: 0>} : vector<8x8xi32>
    %15 = tpu.iota {dimensions = array<i32: 1>} : vector<8x8xi32>
    %16 = arith.cmpi sgt, %15, %14 : vector<8x8xi32>
    %17 = vector.shape_cast %16 : vector<8x8xi1> to vector<1x8x8xi1>
    %cst_8 = arith.constant 0xFF800000 : f32
    %18 = vector.shape_cast %17 : vector<1x8x8xi1> to vector<1x8x8xi1>
    %19 = vector.broadcast %18 : vector<1x8x8xi1> to vector<2x8x8xi1>
    %20 = vector.broadcast %cst_8 : f32 to vector<2x8x8xf32>
    %21 = arith.select %19, %20, %13 : vector<2x8x8xi1>, vector<2x8x8xf32>
    %cst_9 = arith.constant dense<0xFF800000> : vector<2x8xf32>
    %22 = vector.multi_reduction <maximumf>, %21, %cst_9 [2] : vector<2x8x8xf32> to vector<2x8xf32>
    %23 = vector.shape_cast %22 : vector<2x8xf32> to vector<2x8x1xf32>
    %24 = vector.broadcast %23 : vector<2x8x1xf32> to vector<2x8x8xf32>
    %25 = arith.subf %21, %24 : vector<2x8x8xf32>
    %26 = math.exp %25 : vector<2x8x8xf32>
    %cst_10 = arith.constant dense<0.000000e+00> : vector<2x8xf32>
    %27 = vector.multi_reduction <add>, %26, %cst_10 [2] : vector<2x8x8xf32> to vector<2x8xf32>
    %28 = vector.shape_cast %27 : vector<2x8xf32> to vector<2x8x1xf32>
    %29 = tpu.reciprocal %28 : vector<2x8x1xf32> -> vector<2x8x1xf32>
    %30 = vector.broadcast %29 : vector<2x8x1xf32> to vector<2x8x8xf32>
    %31 = arith.mulf %26, %30 : vector<2x8x8xf32>
    %32 = vector.shape_cast %12 : vector<16xf32> to vector<2x8xf32>
    %cst_11 = arith.constant dense<0.000000e+00> : vector<2x8xf32>
    %33 = vector.multi_reduction <add>, %31, %cst_11 [1] : vector<2x8x8xf32> to vector<2x8xf32>
    %34 = arith.mulf %33, %32 : vector<2x8xf32>
    %cst_12 = arith.constant dense<0.000000e+00> : vector<2xf32>
    %35 = vector.multi_reduction <add>, %34, %cst_12 [1] : vector<2x8xf32> to vector<2xf32>
    %36 = vector.shape_cast %35 : vector<2xf32> to vector<1x1x2xf32>
    %c0_13 = arith.constant 0 : index
    %c0_14 = arith.constant 0 : index
    %c0_15 = arith.constant 0 : index
    %37 = vector.load %arg4[%c0_13, %c0_14, %c0_15] : memref<1x1x2xf32, #tpu.memory_space<vmem>>, vector<1x1x2xf32>
    tpu.vector_store %arg4[%c0_13, %c0_14, %c0_15], %36 {strides = array<i32>} : memref<1x1x2xf32, #tpu.memory_space<vmem>>, vector<1x1x2xf32>,
    %38 = vector.shape_cast %12 : vector<16xf32> to vector<1x1x16xf32>
    %c0_16 = arith.constant 0 : index
    %c0_17 = arith.constant 0 : index
    %c0_18 = arith.constant 0 : index
    %39 = vector.load %arg6[%c0_16, %c0_17, %c0_18] : memref<1x1x16xf32, #tpu.memory_space<vmem>>, vector<1x1x16xf32>
    tpu.vector_store %arg6[%c0_16, %c0_17, %c0_18], %38 {strides = array<i32>} : memref<1x1x16xf32, #tpu.memory_space<vmem>>, vector<1x1x16xf32>,
    %40 = vector.shape_cast %31 : vector<2x8x8xf32> to vector<1x2x64xf32>
    %c0_19 = arith.constant 0 : index
    %c0_20 = arith.constant 0 : index
    %c0_21 = arith.constant 0 : index
    %41 = vector.load %arg5[%c0_19, %c0_20, %c0_21] : memref<1x2x64xf32, #tpu.memory_space<vmem>>, vector<1x2x64xf32>
    tpu.vector_store %arg5[%c0_19, %c0_20, %c0_21], %40 {strides = array<i32>} : memref<1x2x64xf32, #tpu.memory_space<vmem>>, vector<1x2x64xf32>,
    return
  }
  func.func @transform_0(%arg0: i32) -> (i32, i32, i32) {
    %c0_i32 = arith.constant 0 : i32
    %c0_i32_0 = arith.constant 0 : i32
    %c0_i32_1 = arith.constant 0 : i32
    return %arg0, %c0_i32, %c0_i32_0 : i32, i32, i32
  }
  func.func @transform_1(%arg0: i32) -> (i32, i32) {
    %c0_i32 = arith.constant 0 : i32
    %c0_i32_0 = arith.constant 0 : i32
    %c0_i32_1 = arith.constant 0 : i32
    return %c0_i32, %c0_i32_0 : i32, i32
  }
  func.func @transform_2(%arg0: i32) -> (i32, i32) {
    %c0_i32 = arith.constant 0 : i32
    %c0_i32_0 = arith.constant 0 : i32
    %c0_i32_1 = arith.constant 0 : i32
    return %c0_i32, %c0_i32_0 : i32, i32
  }
  func.func @transform_3(%arg0: i32) -> (i32, i32, i32) {
    %c0_i32 = arith.constant 0 : i32
    %c0_i32_0 = arith.constant 0 : i32
    %c0_i32_1 = arith.constant 0 : i32
    return %arg0, %c0_i32, %c0_i32_0 : i32, i32, i32
  }
  func.func @transform_4(%arg0: i32) -> (i32, i32, i32) {
    %c0_i32 = arith.constant 0 : i32
    %c0_i32_0 = arith.constant 0 : i32
    %c0_i32_1 = arith.constant 0 : i32
    return %arg0, %c0_i32, %c0_i32_0 : i32, i32, i32
  }
  func.func @transform_5(%arg0: i32) -> (i32, i32, i32) {
    %c0_i32 = arith.constant 0 : i32
    %c0_i32_0 = arith.constant 0 : i32
    %c0_i32_1 = arith.constant 0 : i32
    return %arg0, %c0_i32, %c0_i32_0 : i32, i32, i32
  }
}

</mosaic_0001>

<bundles_post_ra>
// kernel: tpu_custom_call.1
= control target key start
LH: loop header
LB: loop body
LE: loop exit
PB: predicated region body
PF: predicated region fallthrough
CT: control target
= control target key end

     0   :  { %11 = vsyncpa [#allocation3], 0  ;;  %s743_s0 = inlined_call_operand.hbm [shape: f32[2,8,32], index: 0, kind: input, shape index: {}]   ;;  %s744_s1 = inlined_call_operand.hbm [shape: f32[32,384], index: 1, kind: input, shape index: {}]   ;;  %s745_s2 = inlined_call_operand.hbm [shape: f32[1,384], index: 2, kind: input, shape index: {}]   ;;  %s746_s3 = inlined_call_operand.hbm [shape: f32[1,1,2], index: 3, kind: output, shape index: {0}]   ;;  %s747_s4 = inlined_call_operand.hbm [shape: f32[1,2,64], index: 4, kind: output, shape index: {1}]   ;;  %s748_s5 = inlined_call_operand.hbm [shape: f32[1,1,16], index: 5, kind: output, shape index: {2}]  }
   0x1   :  { %12 = vsyncpa [#allocation6], 0 }
   0x2   :  { %13 = vsyncpa [#allocation4], 0  ;;  %s32_s20 = sshll.u32 %s744_s1, 4  ;;  %s33_s20 = int_to_ptr.hbm [resolvable:$true] %s32_s20 }
   0x3   :  { %14 = vsyncpa [#allocation10], 0  ;;  %s635_s21 = smov [#allocation5]   ;;  %s19_s25 = sshll.u32 %s743_s0, 4  ;;  %s20_s25 = int_to_ptr.hbm [resolvable:$true] %s19_s25 }
   0x4   :  { %s34_s22 = sshll.u32 %s635_s21, 4  ;;  %s636_s26 = smov 384   ;;  %s35_s22 = int_to_ptr.vmem [resolvable:$true] %s34_s22 }
   0x5   :  { %s637_s27 = smov 24   ;;  %s638_s28 = smov [#allocation2]  }
   0x6   :  { %40 = dma.hbm_to_vmem [thread:$0]  %s33_s20, 1536, %s35_s22, [#allocation6], %s636_s26, %s636_s26, %s637_s27  }
   0x7   :  { %s21_s29 = sshll.u32 %s638_s28, 4  ;;  %s639_s30 = smov 128   ;;  %s22_s29 = int_to_ptr.vmem [resolvable:$true] %s21_s29 }
   0x8   :  { %s640_s6 = smov 8   ;;  %s46_s8 = sshll.u32 %s745_s2, 4  ;;  %s47_s8 = int_to_ptr.hbm [resolvable:$true] %s46_s8 }
   0x9   :  { %27 = dma.hbm_to_vmem [thread:$0]  %s20_s25, 256, %s22_s29, [#allocation3], %s639_s30, %s639_s30, %s640_s6  }
   0xa   :  { %s641_s9 = smov [#allocation7]  }
   0xb   :  { %s48_s10 = sshll.u32 %s641_s9, 4  ;;  %s49_s10 = int_to_ptr.vmem [resolvable:$true] %s48_s10 }
   0xc   :  { %51 = dma.hbm_to_vmem [thread:$0]  %s47_s8, 48, %s49_s10, [#allocation6]  }
   0xd   :  { %627 = dma.done.wait [#allocation3], 256  }
   0xe   :  { %628 = vsyncadd [#allocation3], 4294967040 }
   0xf   :  { %629 = dma.done.wait [#allocation6], 1584  }
  0x10   :  { %630 = vsyncadd [#allocation6], 4294965712  ;;  %v76_v0 = vld [vmem:[#allocation5 + $0x50] sm:$0xff]  ;;  %v73_v1 = vld [vmem:[#allocation5 + $0x38] sm:$0xff]  ;;  %vm86_vm0 = vcmask 261120   ;;  %v206_v26 = vlaneseq  ;;  %vm215_vm2 = vcmask 64512  }
  0x11   :  { %v75_v2 = vld [vmem:[#allocation5 + $0x48] sm:$0xff]  ;;  %128 = vmatpush.msra.mxu1 %v76_v0  ;;  %v72_v3 = vld [vmem:[#allocation5 + $0x30] sm:$0xff]  ;;  %v70_v4 = vld [vmem:[#allocation5 + $0x20] sm:$0xff]  ;;  %v642_v61 = vmov 1983009808   ;;  %vm309_vm9 = vcmask 1047556  }
  0x12   :  { %105 = vmatpush.msra.mxu0 %v75_v2  ;;  %v69_v5 = vld [vmem:[#allocation5 + $0x18] sm:$0xff]  ;;  %v67_v6 = vld [vmem:[#allocation5 + $0x8] sm:$0xff]  ;;  %v66_v7 = vld [vmem:[#allocation5] sm:$0xff]  ;;  %v207_v27 = vshrl.u32 %v206_v26, 7  ;;  %v699_v28 = vand.u32 127, %v206_v26  ;;  %v312_v62 = vunpack.c.l.s4 %v642_v61  ;;  %vm303_vm10 = vcmask 130112  }
  0x13   :  { %129 = vmatpush.msra.mxu1 %v73_v1  ;;  %v64_v8 = vld [vmem:[#allocation2] sm:$0xff]  ;;  %v65_v9 = vld [vmem:[#allocation2 + $0x8] sm:$0xff]  ;;  %v78_v10 = vld [vmem:[#allocation7] sm:$0x7]  ;;  %vm306_vm13 = vcmask 122880   ;;  %s644_s0 = smov 16  }
  0x14   :  { %106 = vmatpush.msra.mxu0 %v72_v3  ;;  %v81_v11 = vperm.slane %v78_v10, 1  ;;  %v80_v12 = vperm.slane %v78_v10, 0  ;;  %v77_v21 = vld [vmem:[#allocation5 + $0x58] sm:$0xff]  ;;  %v74_v22 = vld [vmem:[#allocation5 + $0x40] sm:$0xff]  ;;  %v71_v23 = vld [vmem:[#allocation5 + $0x28] sm:$0xff]  ;;  %vm210_vm1 = vcmp.gt.s32.totalorder %v699_v28, %v207_v27  ;;  %v82_v38 = vperm.slane %v78_v10, 2 }
  0x15   :  { %130 = vmatpush.msra.mxu1 %v70_v4  ;;  %151 = vmatpush.msra.mxu2 %v77_v21  ;;  %v68_v24 = vld [vmem:[#allocation5 + $0x10] sm:$0xff]  ;;  %v301_v2 = vadd.s32 4294967288, %v699_v28  ;;  %s645_s2 = smov 32   ;;  %s646_s11 = smov 40   ;;  %vm289_vm14 = vcmask 1041409   ;;  %vm292_vm15 = vcmask 58368  }
  0x16   :  { %107 = vmatpush.msra.mxu0 %v69_v5  ;;  %s647_s12 = smov 48   ;;  %s648_s13 = smov 56  }
  0x17   :  { %131 = vmatpush.msra.mxu1 %v67_v6  ;;  %152 = vmatpush.msra.mxu2 %v74_v22  ;;  %v313_v6 = vunpack.c.0.s8 %v312_v62  ;;  %s649_s14 = smov [#allocation9]   ;;  %s421_s18 = sshll.u32 %s747_s4, 4  ;;  %s422_s18 = int_to_ptr.hbm [resolvable:$true] %s421_s18 }
  0x18   :  { %108 = vmatpush.msra.mxu0 %v66_v7  ;;  %454 = vmatmul.msk.f32.vlgmr.msra.gmra.mxu1 %vm86_vm0, %v64_v8  ;;  %s419_s15 = sshll.u32 %s649_s14, 4  ;;  %s650_s19 = smov [#allocation11]   ;;  %s420_s15 = int_to_ptr.vmem [resolvable:$true] %s419_s15 }
  0x19   :  { %452 = vmatmul.msk.f32.vlgmr.msra.gmra.mxu0 %vm86_vm0, %v64_v8  ;;  %153 = vmatpush.msra.mxu2 %v71_v23  ;;  %s430_s20 = sshll.u32 %s650_s19, 4  ;;  %s432_s23 = sshll.u32 %s748_s5, 4  ;;  %s431_s20 = int_to_ptr.vmem [resolvable:$true] %s430_s20  ;;  %s433_s23 = int_to_ptr.hbm [resolvable:$true] %s432_s23 }
  0x1a   :  { %s651_s4 = smov [#allocation8]  }
  0x1b   :  { %154 = vmatpush.msra.mxu2 %v68_v24  ;;  %s408_s24 = sshll.u32 %s651_s4, 4  ;;  %s409_s24 = int_to_ptr.vmem [resolvable:$true] %s408_s24 }
  0x1c   :  { %456 = vmatmul.msk.f32.vlgmr.msra.gmra.mxu2 %vm86_vm0, %v64_v8 }
  0x20   :  { %455 = vmatmul.msk.f32.gmra.mxu1 %vm86_vm0, %v65_v9 }
  0x21   :  { %453 = vmatmul.msk.f32.gmra.mxu0 %vm86_vm0, %v65_v9 }
  0x24   :  { %457 = vmatmul.msk.f32.gmra.mxu2 %vm86_vm0, %v65_v9 }
  0x95   :  { %v133_v13 = vpop.f32.mrf.mxu1 }
  0x96   :  { %v110_v14 = vpop.f32.mrf.mxu0  ;;  %v134_v15 = vadd.f32 %v133_v13, %v81_v11 }
  0x97   :  { %v111_v16 = vadd.f32 %v110_v14, %v80_v12  ;;  %v643_v14 = vmov 1934713408  }
  0x98   :  { %181 = vmatpush.xpose.msra.mxu3 %v134_v15  ;;  %v334_v15 = vunpack.c.l.s4 %v643_v14 }
  0x9a   :  { %v335_v23 = vunpack.c.0.s8 %v334_v15 }
  0x9b   :  { %182 = vmatmul.f32.vlgmr.msra.gmra.mxu3 %v111_v16 }
  0x9d   :  { %v136_v17 = vpop.f32.mrf.mxu1 }
  0x9e   :  { %v113_v18 = vpop.f32.mrf.mxu0  ;;  %v137_v19 = vadd.f32 %v136_v17, %v81_v11 }
  0x9f   :  { %v114_v20 = vadd.f32 %v113_v18, %v80_v12  ;;  %v156_v35 = vpop.f32.mrf.mxu2 }
  0xa0   :  { %201 = vmatpush.xpose.msrb.mxu3 %v137_v19  ;;  %v157_v46 = vadd.f32 %v156_v35, %v82_v38 }
  0xa3   :  { %202 = vmatmul.f32.vlgmr.msrb.gmra.mxu3 %v114_v20 }
  0xa7   :  { %v159_v40 = vpop.f32.mrf.mxu2 }
  0xa8   :  { %v160_v42 = vadd.f32 %v159_v40, %v82_v38 }
  0xaa   :  { %164 = vadd.xlane.f32.xlu2 %v160_v42 }
  0xb2   :  { %162 = vadd.xlane.f32.xlu2 %v157_v46 }
 0x11d   :  { %v706_v54 = vpop.xlane.xlu2 %164 }
 0x11e   :  { %v183_v25 = vpop.f32.mrf.mxu3  ;;  %v302_v10 = vperm.slane %v706_v54, %v301_v2 }
 0x11f   :  { %v213_v32 = vsel %vm210_vm1, -inf, %v183_v25 }
 0x120   :  { %v216_v33 = vsel %vm215_vm2, %v213_v32, -inf }
 0x125   :  { %v163_v9 = vpop.xlane.xlu2 %162 }
 0x126   :  { %v203_v29 = vpop.f32.mrf.mxu3  ;;  %v711_v16 = vperm.slane %v163_v9, %v699_v28 }
 0x127   :  { %v214_v30 = vsel %vm210_vm1, -inf, %v203_v29  ;;  %vm390_vm1 = vcmask 130048  }
 0x128   :  { %v219_v31 = vsel %vm215_vm2, %v214_v30, -inf  ;;  %v304_v20 = vsel %vm303_vm10, %v302_v10, %v711_v16 }
 0x129   :  { %220 = vmax.xlane.f32.xlu0 %v219_v31  ;;  %307 = vst.msk [vmem:[#allocation11] sm:$0x1] %vm306_vm13, %v304_v20 }
 0x131   :  { %217 = vmax.xlane.f32.xlu0 %v216_v33 }
 0x19c   :  { %v221_v34 = vpop.xlane.xlu0 %220 }
 0x19d   :  { %v223_v36 = vsub.f32 %v214_v30, %v221_v34 }
 0x19f   :  { %v226_v37 = vmul.f32 1.442695, %v223_v36 }
 0x1a1   :  { %475 = vpow2.f32 %v226_v37 }
 0x1a4   :  { %v218_v39 = vpop.xlane.xlu0 %217 }
 0x1a5   :  { %v222_v41 = vsub.f32 %v213_v32, %v218_v39 }
 0x1a7   :  { %v476_v43 = vpop.eup %475  ;;  %v224_v44 = vmul.f32 1.442695, %v222_v41 }
 0x1a8   :  { %v231_v45 = vsel %vm215_vm2, %v476_v43, 0.0 }
 0x1a9   :  { %477 = vpow2.f32 %v224_v44  ;;  %232 = vadd.xlane.f32.xlu1 %v231_v45 }
 0x1af   :  { %v478_v47 = vpop.eup %477 }
 0x1b0   :  { %v228_v48 = vsel %vm215_vm2, %v478_v47, 0.0 }
 0x1b1   :  { %229 = vadd.xlane.f32.xlu1 %v228_v48 }
 0x21c   :  { %v233_v49 = vpop.xlane.xlu1 %232 }
 0x21d   :  { %479 = vrcp.f32 %v233_v49  ;;  %v259_v55 = vand.u32 2147483648, %v233_v49  ;;  %v257_v57 = vand.u32 2147483647, %v233_v49  ;;  %vm253_vm4 = vweird.f32 %v233_v49 }
 0x21f   :  { %v260_v60 = vor.u32 1.1754944e-38, %v259_v55  ;;  %vm258_vm6 = vcmp.eq.f32.partialorder %v257_v57, 8.507059e+37 }
 0x223   :  { %v480_v50 = vpop.eup %479 }
 0x224   :  { %v249_v51 = vmul.f32 %v480_v50, %v233_v49  ;;  %v230_v52 = vpop.xlane.xlu1 %229  ;;  %vm254_vm3 = vweird.f32 %v480_v50 }
 0x225   :  { %481 = vrcp.f32 %v230_v52  ;;  %vm255_vm5 = vmor %vm253_vm4, %vm254_vm3  ;;  %v245_v5 = vand.u32 2147483648, %v230_v52  ;;  %v243_v8 = vand.u32 2147483647, %v230_v52  ;;  %vm239_vm8 = vweird.f32 %v230_v52 }
 0x226   :  { %v250_v53 = vsub.f32 1.0, %v249_v51  ;;  %vm392_vm3 = vcmask 195584   ;;  %vm395_vm4 = vcmask 326656  }
 0x227   :  { %v246_v13 = vor.u32 1.1754944e-38, %v245_v5  ;;  %vm244_vm12 = vcmp.eq.f32.partialorder %v243_v8, 8.507059e+37 }
 0x228   :  { %v251_v56 = vmul.f32 %v480_v50, %v250_v53 }
 0x22a   :  { %v252_v58 = vadd.f32 %v480_v50, %v251_v56 }
 0x22b   :  { %v482_v59 = vpop.eup %481 }
 0x22c   :  { %v256_v63 = vsel %vm255_vm5, %v480_v50, %v252_v58  ;;  %v235_v0 = vmul.f32 %v482_v59, %v230_v52  ;;  %vm240_vm7 = vweird.f32 %v482_v59  ;;  %vm397_vm5 = vcmask 392192  }
 0x22d   :  { %v261_v1 = vsel %vm258_vm6, %v260_v60, %v256_v63  ;;  %vm241_vm11 = vmor %vm239_vm8, %vm240_vm7  ;;  %vm399_vm6 = vcmask 457728  }
 0x22e   :  { %v263_v3 = vmul.f32 %v476_v43, %v261_v1  ;;  %v236_v4 = vsub.f32 1.0, %v235_v0  ;;  %v281_v0 = vperm.slane %v706_v54, %v699_v28 }
 0x230   :  { %v237_v7 = vmul.f32 %v482_v59, %v236_v4  ;;  %v319_v11 = vrot.slane %v263_v3, 4  ;;  %v324_v18 = vperm.slane %v263_v3, %v313_v6  ;;  %v271_v44 = vsel %vm215_vm2, %v263_v3, 0.0 }
 0x231   :  { %v272_v48 = vrot.slane %v271_v44, 4 }
 0x232   :  { %v238_v12 = vadd.f32 %v482_v59, %v237_v7  ;;  %v320_v21 = vsel %vm309_vm9, 0.0, %v319_v11  ;;  %v329_v25 = vrot.slane %v324_v18, 4 }
 0x233   :  { %v328_v27 = vperm.slane %v320_v21, %v313_v6  ;;  %v273_v52 = vadd.f32 %v272_v48, %v271_v44 }
 0x234   :  { %v242_v17 = vsel %vm241_vm11, %v482_v59, %v238_v12 }
 0x235   :  { %v247_v19 = vsel %vm244_vm12, %v246_v13, %v242_v17  ;;  %v341_v35 = vrot.slane %v328_v27, 4  ;;  %v274_v56 = vrot.slane %v273_v52, 2 }
 0x236   :  { %v262_v22 = vmul.f32 %v478_v47, %v247_v19 }
 0x237   :  { %v275_v59 = vadd.f32 %v274_v56, %v273_v52 }
 0x238   :  { %v314_v24 = vperm.slane %v262_v22, %v313_v6  ;;  %v308_v26 = vrot.slane %v262_v22, 4  ;;  %v264_v46 = vsel %vm215_vm2, %v262_v22, 0.0 }
 0x239   :  { %v265_v49 = vrot.slane %v264_v46, 4  ;;  %v276_v61 = vrot.slane %v275_v59, 1 }
 0x23a   :  { %v331_v29 = vrot.slane %v314_v24, 4  ;;  %v330_v30 = vsel %vm309_vm9, %v329_v25, %v314_v24  ;;  %v310_v31 = vsel %vm309_vm9, 0.0, %v308_v26 }
 0x23b   :  { %v336_v32 = vperm.slane %v330_v30, %v335_v23  ;;  %v318_v33 = vperm.slane %v310_v31, %v313_v6  ;;  %v266_v53 = vadd.f32 %v265_v49, %v264_v46  ;;  %v277_v63 = vadd.f32 %v276_v61, %v275_v59 }
 0x23c   :  { %v332_v34 = vsel %vm309_vm9, %v324_v18, %v331_v29 }
 0x23d   :  { %v340_v36 = vperm.slane %v332_v34, %v335_v23  ;;  %v353_v37 = vrot.slane %v336_v32, 4  ;;  %v342_v38 = vsel %vm309_vm9, %v341_v35, %v318_v33  ;;  %v343_v43 = vrot.slane %v318_v33, 4 }
 0x23e   :  { %v348_v42 = vperm.slane %v342_v38, %v335_v23  ;;  %v267_v57 = vrot.slane %v266_v53, 2  ;;  %v285_v2 = vmul.f32 %v281_v0, %v277_v63 }
 0x23f   :  { %366 = vrot.lane.b32.xlu1 %v340_v36, %s644_s0  ;;  %v354_v39 = vsel %vm309_vm9, 0.0, %v353_v37  ;;  %v355_v40 = vrot.slane %v340_v36, 4  ;;  %v344_v47 = vsel %vm309_vm9, %v328_v27, %v343_v43 }
 0x240   :  { %362 = vrot.lane.b32.xlu0 %v354_v39, %s640_s6  ;;  %v357_v45 = vrot.slane %v348_v42, 4  ;;  %v352_v51 = vperm.slane %v344_v47, %v335_v23  ;;  %v268_v60 = vadd.f32 %v267_v57, %v266_v53  ;;  %v288_v4 = vrot.slane %v285_v2, 7 }
 0x241   :  { %v356_v41 = vsel %vm309_vm9, 0.0, %v355_v40 }
 0x242   :  { %370 = vrot.lane.b32.xlu2 %v356_v41, %s637_s27  ;;  %v358_v50 = vsel %vm309_vm9, 0.0, %v357_v45  ;;  %v359_v55 = vrot.slane %v352_v51, 4  ;;  %v269_v62 = vrot.slane %v268_v60, 1  ;;  %s410_s27 = sshll.u32 %s746_s3, 4  ;;  %s411_s27 = int_to_ptr.hbm [resolvable:$true] %s410_s27 }
 0x244   :  { %v360_v58 = vsel %vm309_vm9, 0.0, %v359_v55  ;;  %v270_v1 = vadd.f32 %v269_v62, %v268_v60 }
 0x246   :  { %v284_v3 = vmul.f32 %v711_v16, %v270_v1 }
 0x248   :  { %374 = vrot.lane.b32.xlu0 %v348_v42, %s645_s2  ;;  %v290_v5 = vsel %vm289_vm14, %v288_v4, %v284_v3 }
 0x249   :  { %v293_v6 = vsel %vm292_vm15, %v290_v5, 0.0 }
 0x24a   :  { %378 = vrot.lane.b32.xlu2 %v358_v50, %s646_s11 }
 0x250   :  { %382 = vrot.lane.b32.xlu0 %v352_v51, %s647_s12 }
 0x252   :  { %386 = vrot.lane.b32.xlu2 %v360_v58, %s648_s13 }
 0x269   :  { %294 = vadd.xlane.f32.xlu1 %v293_v6 }
 0x29c   :  { %v371_v7 = vpop.permute.xlu2 %370 }
 0x2a4   :  { %v379_v10 = vpop.permute.xlu2 %378 }
 0x2ac   :  { %v387_v17 = vpop.permute.xlu2 %386 }
 0x2b1   :  { %v367_v11 = vpop.permute.xlu1 %366 }
 0x2b2   :  { %v363_v8 = vpop.permute.xlu0 %362 }
 0x2b3   :  { %v389_v9 = vsel %vm215_vm2, %v336_v32, %v363_v8  ;;  %vm401_vm2 = vcmask 517120  }
 0x2b4   :  { %v391_v13 = vsel %vm390_vm1, %v389_v9, %v367_v11 }
 0x2b5   :  { %v393_v54 = vsel %vm392_vm3, %v391_v13, %v371_v7 }
 0x2ba   :  { %v375_v12 = vpop.permute.xlu0 %374 }
 0x2bb   :  { %v394_v14 = vsel %vm86_vm0, %v393_v54, %v375_v12  ;;  %vm299_vm0 = vcmask 8192  }
 0x2bc   :  { %v396_v16 = vsel %vm395_vm4, %v394_v14, %v379_v10 }
 0x2c2   :  { %v383_v15 = vpop.permute.xlu0 %382 }
 0x2c3   :  { %v398_v18 = vsel %vm397_vm5, %v396_v16, %v383_v15 }
 0x2c4   :  { %v400_v19 = vsel %vm399_vm6, %v398_v18, %v387_v17 }
 0x2c5   :  { %402 = vst.msk [vmem:[#allocation9] sm:$0x3] %vm401_vm2, %v400_v19 }
 0x2c6   :  { %424 = dma.vmem_to_hbm [thread:$0]  %s420_s15, 32, %s422_s18, [#allocation10]  }
 0x2c7   :  { %435 = dma.vmem_to_hbm [thread:$0]  %s431_s20, 16, %s433_s23, [#allocation10]  }
 0x2dc   :  { %v295_v20 = vpop.xlane.xlu1 %294 }
 0x2dd   :  { %v297_v21 = vperm.slane %v295_v20, %v699_v28 }
 0x2df   :  { %300 = vst.msk [vmem:[#allocation8] sm:$0x1] %vm299_vm0, %v297_v21 }
 0x2e0   :  { %413 = dma.vmem_to_hbm [thread:$0]  %s409_s24, 16, %s411_s27, [#allocation4]  }
 0x2e1   :  { %631 = dma.done.wait [#allocation4], 16  }
 0x2e2   :  { %632 = vsyncadd [#allocation4], 4294967280 }
 0x2e3   :  { %633 = dma.done.wait [#allocation10], 48  }
 0x2e4   :  { %634 = vsyncadd [#allocation10], 4294967248 }
 0x2e5   :  { %448 = vsyncpa [#allocation3], 1 }
 0x2e6   :  { %449 = vsyncpa [#allocation6], 1 }
 0x2e7   :  { %450 = vsyncpa [#allocation4], 1 }
 0x2e8   :  { %451 = vsyncpa [#allocation10], 1 }

</bundles_post_ra>
